<compile_context>
chip_gen: v6e
topology: v6e:2x2x1
jax: 0.10.0
libtpu: 0.0.40
codegen_flags: <defaults>
</compile_context>

<pallas_src>
import functools

import jax
import jax.numpy as jnp
from jax.experimental import pallas as pl
from jax.experimental.pallas import tpu as pltpu


def _round_up(x, m):
    return (x + m - 1) // m * m


def _cdiv(a, b):
    return (a + b - 1) // b


def _value_head_kernel(x_ref, w1_ref, b1_ref, w2_ref, b2_ref, o_ref):
    # x arrives in its native dtype; cast to bf16 on the VPU (free filler
    # under the x DMA), then fc1 on the MXU with f32 accumulation.
    x = x_ref[...].astype(jnp.bfloat16)
    h = jnp.dot(x, w1_ref[...], preferred_element_type=jnp.float32)
    h = jnp.maximum(h + b1_ref[...], 0.0)                 # bias + ReLU in f32 (VPU)
    # fc2: (TM, 128) @ (128, 1) on the MXU, f32 accumulate.
    y = jnp.dot(h.astype(jnp.bfloat16), w2_ref[...],
                preferred_element_type=jnp.float32)
    y = y + b2_ref[...]                                   # (1, 1) broadcast
    o_ref[...] = jnp.tanh(y).astype(o_ref.dtype)          # Tanh on the EUP


def _choose_row_tiling(m, itemsize, block_m, *, min_block=512, min_tiles=4):
    """Pick (tile_rows, num_tiles, sublane_granule) for the row dimension.

    Goals: tiles as large as possible (amortize per-step overhead), but keep
    >= `min_tiles` grid steps when each tile can still hold >= `min_block`
    rows (v7x 2-TC sharding + pipelining), and keep padding waste < one
    sublane group per tile.
    """
    sub = {4: 8, 2: 16, 1: 32}.get(itemsize, 8)   # sublane packing granule
    n = _cdiv(m, block_m)
    if n < min_tiles:
        n = max(n, min(min_tiles, m // min_block))
        n = max(n, 1)
    tm = _round_up(_cdiv(m, n), sub)
    n = _cdiv(m, tm)
    return tm, n, sub


@functools.partial(jax.jit, static_argnames=("block_m",))
def value_head_forward(x, w1, b1, w2, b2, *, block_m=2048):
    """ValueHead forward: tanh(relu(x @ w1 + b1) @ w2 + b2).

    x: (..., D); w1: (D, H); b1: (H,); w2: (H, O); b2: (O,).
    """
    orig_lead = x.shape[:-1]
    D = x.shape[-1]
    H = w1.shape[1]
    O = w2.shape[1]

    M = 1
    for d in orig_lead:
        M *= int(d)

    x2d = x.reshape(M, D)                        # native dtype: no wrapper cast

    itemsize = jnp.dtype(x.dtype).itemsize
    TM, n_tiles, sub = _choose_row_tiling(M, itemsize, block_m)

    # Only pad when M is not sublane-aligned (rare, < `sub` rows); otherwise
    # rely on Pallas' partial boundary block for the last tile — no HBM copy.
    M_in = _round_up(M, sub)
    if M_in != M:
        x2d = jnp.pad(x2d, ((0, M_in - M), (0, 0)))

    # Small resident operands: bf16 weights (MXU-native), f32 biases.
    w1_bf = w1.astype(jnp.bfloat16)
    w2_bf = w2.astype(jnp.bfloat16)
    b1_2d = b1.reshape(1, H).astype(jnp.float32)
    b2_2d = b2.reshape(1, O).astype(jnp.float32)

    out_itemsize = jnp.dtype(x.dtype).itemsize
    cost = pl.CostEstimate(
        flops=2 * M * (D * H + H * O),
        transcendentals=M * O,
        bytes_accessed=(M_in * D * itemsize        # x streamed in native dtype
                        + M * O * out_itemsize     # output column
                        + (D * H + H * O) * 2      # bf16 weights (resident)
                        + (H + O) * 4),            # f32 biases (resident)
    )

    out2d = pl.pallas_call(
        _value_head_kernel,
        out_shape=jax.ShapeDtypeStruct((M, O), x.dtype),
        grid=(n_tiles,),
        in_specs=[
            pl.BlockSpec((TM, D), lambda i: (i, 0)),   # x: streamed row tiles
            pl.BlockSpec((D, H), lambda i: (0, 0)),    # w1: resident in VMEM
            pl.BlockSpec((1, H), lambda i: (0, 0)),    # b1: resident
            pl.BlockSpec((H, O), lambda i: (0, 0)),    # w2: resident
            pl.BlockSpec((1, O), lambda i: (0, 0)),    # b2: resident
        ],
        out_specs=pl.BlockSpec((TM, O), lambda i: (i, 0)),
        compiler_params=pltpu.CompilerParams(
            dimension_semantics=("parallel",)),        # row tiles shard across TCs
        cost_estimate=cost,
    )(x2d, w1_bf, b1_2d, w2_bf, b2_2d)

    return out2d.reshape(*orig_lead, O)


if __name__ == "__main__":
    # Shapes consistent with ValueHead(n_features=384): hidden 128, out 1.
    B, S = 2, 8
    D, H, O = 384, 128, 1

    key = jax.random.PRNGKey(0)
    kx, kw1, kb1, kw2, kb2 = jax.random.split(key, 5)

    x = jax.random.normal(kx, (B, S, D), dtype=jnp.float32)
    w1 = jax.random.normal(kw1, (D, H), dtype=jnp.float32) * 0.05
    b1 = jax.random.normal(kb1, (H,), dtype=jnp.float32) * 0.05
    w2 = jax.random.normal(kw2, (H, O), dtype=jnp.float32) * 0.05
    b2 = jax.random.normal(kb2, (O,), dtype=jnp.float32) * 0.05

    out = value_head_forward(x, w1, b1, w2, b2)
    jax.block_until_ready(out)
    assert out.shape == (B, S, O)

    # Reference with the same bf16-operand / f32-accumulate pattern (tight).
    xb = x.reshape(-1, D).astype(jnp.bfloat16)
    h_ref = jnp.dot(xb, w1.astype(jnp.bfloat16),
                    preferred_element_type=jnp.float32) + b1
    h_ref = jnp.maximum(h_ref, 0.0)
    y_ref = jnp.dot(h_ref.astype(jnp.bfloat16), w2.astype(jnp.bfloat16),
                    preferred_element_type=jnp.float32) + b2
    ref = jnp.tanh(y_ref).reshape(B, S, O)
    assert jnp.allclose(out, ref, atol=1e-3, rtol=1e-3), "mismatch vs bf16 reference"

    # Sanity vs full-f32 math (looser tolerance due to bf16 matmul operands).
    ref32 = jnp.tanh(jnp.maximum(x @ w1 + b1, 0.0) @ w2 + b2)
    assert jnp.allclose(out, ref32, atol=5e-2, rtol=5e-2), "mismatch vs f32 reference"

    print("KERNEL_OK")
</pallas_src>

<mosaic_0001>
module attributes {stable_mosaic.version = 11 : i64} {
  func.func @_value_head_kernel(%arg0: i32, %arg1: memref<16x384xf32, #tpu.memory_space<vmem>>, %arg2: memref<384x128xbf16, #tpu.memory_space<vmem>>, %arg3: memref<1x128xf32, #tpu.memory_space<vmem>>, %arg4: memref<128x1xbf16, #tpu.memory_space<vmem>>, %arg5: memref<1x1xf32, #tpu.memory_space<vmem>>, %arg6: memref<16x1xf32, #tpu.memory_space<vmem>>) attributes {dimension_semantics = [#tpu.dimension_semantics<parallel>], iteration_bounds = array<i64: 1>, scalar_prefetch = 0 : i64, scratch_operands = 0 : i64, tpu.core_type = #tpu.core_type<tc>, window_params = [{transform_indices = @transform_0, window_bounds = array<i64: 16, 384>}, {pipeline_mode = #tpu.pipeline_mode<synchronous>, transform_indices = @transform_1, window_bounds = array<i64: 384, 128>}, {pipeline_mode = #tpu.pipeline_mode<synchronous>, transform_indices = @transform_2, window_bounds = array<i64: 1, 128>}, {pipeline_mode = #tpu.pipeline_mode<synchronous>, transform_indices = @transform_3, window_bounds = array<i64: 128, 1>}, {pipeline_mode = #tpu.pipeline_mode<synchronous>, transform_indices = @transform_4, window_bounds = array<i64: 1, 1>}, {transform_indices = @transform_5, window_bounds = array<i64: 16, 1>}]} {
    %c0 = arith.constant 0 : index
    %c0_0 = arith.constant 0 : index
    %0 = vector.load %arg1[%c0, %c0_0] : memref<16x384xf32, #tpu.memory_space<vmem>>, vector<16x384xf32>
    %1 = arith.truncf %0 : vector<16x384xf32> to vector<16x384xbf16>
    %c0_1 = arith.constant 0 : index
    %c0_2 = arith.constant 0 : index
    %2 = vector.load %arg2[%c0_1, %c0_2] : memref<384x128xbf16, #tpu.memory_space<vmem>>, vector<384x128xbf16>
    %cst = arith.constant dense<0.000000e+00> : vector<16x128xf32>
    %3 = tpu.matmul %1, %2, %cst {dimension_numbers = #tpu.dot_dimension_numbers<[1], [0], [0], [1], [0, 0, 1, 1], [], []>} : vector<16x384xbf16>, vector<384x128xbf16>, vector<16x128xf32> -> vector<16x128xf32>
    %c0_3 = arith.constant 0 : index
    %c0_4 = arith.constant 0 : index
    %4 = vector.load %arg3[%c0_3, %c0_4] : memref<1x128xf32, #tpu.memory_space<vmem>>, vector<1x128xf32>
    %5 = vector.broadcast %4 : vector<1x128xf32> to vector<16x128xf32>
    %6 = arith.addf %3, %5 : vector<16x128xf32>
    %cst_5 = arith.constant 0.000000e+00 : f32
    %7 = vector.broadcast %cst_5 : f32 to vector<16x128xf32>
    %8 = arith.maximumf %6, %7 : vector<16x128xf32>
    %9 = arith.truncf %8 : vector<16x128xf32> to vector<16x128xbf16>
    %c0_6 = arith.constant 0 : index
    %c0_7 = arith.constant 0 : index
    %10 = vector.load %arg4[%c0_6, %c0_7] : memref<128x1xbf16, #tpu.memory_space<vmem>>, vector<128x1xbf16>
    %cst_8 = arith.constant dense<0.000000e+00> : vector<16x1xf32>
    %11 = tpu.matmul %9, %10, %cst_8 {dimension_numbers = #tpu.dot_dimension_numbers<[1], [0], [0], [1], [0, 0, 1, 1], [], []>} : vector<16x128xbf16>, vector<128x1xbf16>, vector<16x1xf32> -> vector<16x1xf32>
    %c0_9 = arith.constant 0 : index
    %c0_10 = arith.constant 0 : index
    %12 = vector.load %arg5[%c0_9, %c0_10] : memref<1x1xf32, #tpu.memory_space<vmem>>, vector<1x1xf32>
    %13 = vector.broadcast %12 : vector<1x1xf32> to vector<16x1xf32>
    %14 = arith.addf %11, %13 : vector<16x1xf32>
    %15 = math.tanh %14 : vector<16x1xf32>
    %c0_11 = arith.constant 0 : index
    %c0_12 = arith.constant 0 : index
    %16 = vector.load %arg6[%c0_11, %c0_12] : memref<16x1xf32, #tpu.memory_space<vmem>>, vector<16x1xf32>
    tpu.vector_store %arg6[%c0_11, %c0_12], %15 {strides = array<i32>} : memref<16x1xf32, #tpu.memory_space<vmem>>, vector<16x1xf32>,
    return
  }
  func.func @transform_0(%arg0: i32) -> (i32, i32) {
    %c0_i32 = arith.constant 0 : i32
    %c0_i32_0 = arith.constant 0 : i32
    return %arg0, %c0_i32 : i32, i32
  }
  func.func @transform_1(%arg0: i32) -> (i32, i32) {
    %c0_i32 = arith.constant 0 : i32
    %c0_i32_0 = arith.constant 0 : i32
    %c0_i32_1 = arith.constant 0 : i32
    return %c0_i32, %c0_i32_0 : i32, i32
  }
  func.func @transform_2(%arg0: i32) -> (i32, i32) {
    %c0_i32 = arith.constant 0 : i32
    %c0_i32_0 = arith.constant 0 : i32
    %c0_i32_1 = arith.constant 0 : i32
    return %c0_i32, %c0_i32_0 : i32, i32
  }
  func.func @transform_3(%arg0: i32) -> (i32, i32) {
    %c0_i32 = arith.constant 0 : i32
    %c0_i32_0 = arith.constant 0 : i32
    %c0_i32_1 = arith.constant 0 : i32
    return %c0_i32, %c0_i32_0 : i32, i32
  }
  func.func @transform_4(%arg0: i32) -> (i32, i32) {
    %c0_i32 = arith.constant 0 : i32
    %c0_i32_0 = arith.constant 0 : i32
    %c0_i32_1 = arith.constant 0 : i32
    return %c0_i32, %c0_i32_0 : i32, i32
  }
  func.func @transform_5(%arg0: i32) -> (i32, i32) {
    %c0_i32 = arith.constant 0 : i32
    %c0_i32_0 = arith.constant 0 : i32
    return %arg0, %c0_i32 : i32, i32
  }
}

</mosaic_0001>

<bundles_post_ra>
// kernel: value_head_forward.1
= control target key start
LH: loop header
LB: loop body
LE: loop exit
PB: predicated region body
PF: predicated region fallthrough
CT: control target
= control target key end

     0   :  { %v589_v1 = vmov 0.0   ;;  %vm590_vm0 = vmmov 0   ;;  %vm430_vm1 = vcmask 7168   ;;  %s767_s1 = inlined_call_operand.vmem [shape: bf16[384,128], index: 1, kind: input, shape index: {}]   ;;  %s768_s0 = inlined_call_operand.vmem [shape: f32[16,384], index: 0, kind: input, shape index: {}]   ;;  %s769_s3 = inlined_call_operand.vmem [shape: bf16[128,1], index: 3, kind: input, shape index: {}]   ;;  %s770_s4 = inlined_call_operand.<no memory space> [shape: f32[1,1], index: 4, kind: input, shape index: {}]   ;;  %s771_s2 = inlined_call_operand.vmem [shape: f32[1,128], index: 2, kind: input, shape index: {}]   ;;  %s772_s5 = inlined_call_operand.vmem [shape: f32[16,1], index: 5, kind: output, shape index: {}]  }
   0x1   :  { %v553_v0 = vld [vmem:[%s767_s1 + $0x78] sm:$0xff]   ;;  %511 = vmatprep.subr.bf16.mxu1 %v589_v1  ;;  %527 = vmatprep.mubr.msk.bf16.mxu1 %vm590_vm0, %v589_v1  ;;  %v556_v4 = vld [vmem:[%s767_s1 + $0x70] sm:$0xff]   ;;  %v559_v7 = vld [vmem:[%s767_s1 + $0x68] sm:$0xff]   ;;  %v10_v42 = vstv %s770_s4 }
   0x2   :  { %v554_v2 = vld [vmem:[%s767_s1 + $0x38] sm:$0xff]   ;;  %471 = vmatprep.subr.bf16.mxu0 %v553_v0  ;;  %v557_v5 = vld [vmem:[%s767_s1 + $0x30] sm:$0xff]   ;;  %v560_v8 = vld [vmem:[%s767_s1 + $0x28] sm:$0xff]   ;;  %11 = vst [vmem:[#allocation2] sm:$0x1] %v10_v42 }
   0x3   :  { %v555_v3 = vld [vmem:[%s767_s1 + $0xb8] sm:$0xff]   ;;  %472 = vmatpush3.bf16.msra.mxu0 %v554_v2  ;;  %v558_v6 = vld [vmem:[%s767_s1 + $0xb0] sm:$0xff]   ;;  %v561_v9 = vld [vmem:[%s767_s1 + $0xa8] sm:$0xff]  }
   0x4   :  { %512 = vmatpush3.bf16.msra.mxu1 %v555_v3  ;;  %473 = vmatprep.subr.bf16.mxu0 %v556_v4  ;;  %v562_v10 = vld [vmem:[%s767_s1 + $0x60] sm:$0xff]   ;;  %v565_v13 = vld [vmem:[%s767_s1 + $0x58] sm:$0xff]   ;;  %v568_v16 = vld [vmem:[%s767_s1 + $0x50] sm:$0xff]  }
   0x5   :  { %513 = vmatprep.subr.bf16.mxu1 %v589_v1  ;;  %v563_v11 = vld [vmem:[%s767_s1 + $0x20] sm:$0xff]   ;;  %v566_v14 = vld [vmem:[%s767_s1 + $0x18] sm:$0xff]   ;;  %v569_v17 = vld [vmem:[%s767_s1 + $0x10] sm:$0xff]  }
   0x6   :  { %v564_v12 = vld [vmem:[%s767_s1 + $0xa0] sm:$0xff]   ;;  %v567_v15 = vld [vmem:[%s767_s1 + $0x98] sm:$0xff]   ;;  %v570_v18 = vld [vmem:[%s767_s1 + $0x90] sm:$0xff]  }
   0x7   :  { %474 = vmatpush3.bf16.msra.mxu0 %v557_v5  ;;  %v571_v19 = vld [vmem:[%s767_s1 + $0x48] sm:$0xff]   ;;  %v574_v22 = vld [vmem:[%s767_s1 + $0x40] sm:$0xff]   ;;  %v26_v29 = vld [vmem:[%s768_s0 + $0x18] sm:$0xff] }
   0x8   :  { %514 = vmatpush3.bf16.msra.mxu1 %v558_v6  ;;  %475 = vmatprep.subr.bf16.mxu0 %v559_v7  ;;  %v572_v20 = vld [vmem:[%s767_s1 + $0x8] sm:$0xff]   ;;  %v27_v24 = vld [vmem:[%s768_s0 + $0x20] sm:$0xff]  ;;  %v25_v30 = vld [vmem:[%s768_s0 + $0x10] sm:$0xff] }
   0x9   :  { %515 = vmatprep.subr.bf16.mxu1 %v589_v1  ;;  %v573_v21 = vld [vmem:[%s767_s1 + $0x88] sm:$0xff]   ;;  %v575_v25 = vld [vmem:[%s767_s1] sm:$0xff]   ;;  %v577_v32 = vld [vmem:[%s769_s3 + $0x38] sm:$0xff]  }
   0xa   :  { %v24_v23 = vld [vmem:[%s768_s0 + $0x8] sm:$0xff]  ;;  %v23_v27 = vld [vmem:[%s768_s0] sm:$0xff]  ;;  %v578_v35 = vld [vmem:[%s769_s3 + $0x30] sm:$0xff]  }
   0xb   :  { %476 = vmatpush3.bf16.msra.mxu0 %v560_v8  ;;  %v30_v26 = vpack.c.bf16 %v27_v24, %v24_v23  ;;  %v576_v28 = vld [vmem:[%s767_s1 + $0x80] sm:$0xff]   ;;  %v28_v31 = vld [vmem:[%s768_s0 + $0x28] sm:$0xff]  ;;  %v29_v33 = vpack.c.bf16 %v26_v29, %v23_v27  ;;  %v581_v38 = vld [vmem:[%s769_s3 + $0x18] sm:$0xff]  }
   0xc   :  { %516 = vmatpush3.bf16.msra.mxu1 %v561_v9  ;;  %477 = vmatprep.subr.bf16.mxu0 %v562_v10  ;;  %v31_v34 = vpack.c.bf16 %v28_v31, %v25_v30  ;;  %v579_v36 = vld [vmem:[%s769_s3 + $0x28] sm:$0xff]   ;;  %v580_v37 = vld [vmem:[%s769_s3 + $0x20] sm:$0xff]   ;;  %v582_v39 = vld [vmem:[%s769_s3 + $0x10] sm:$0xff]  }
   0xd   :  { %517 = vmatprep.subr.bf16.mxu1 %v589_v1  ;;  %263 = vmatprep.mubr.bf16.mxu0 %v30_v26  ;;  %v583_v40 = vld [vmem:[%s769_s3 + $0x8] sm:$0xff]   ;;  %v584_v41 = vld [vmem:[%s769_s3] sm:$0xff]  }
   0xe   :  { %v437_v45 = vld [vmem:[%s771_s2] ss:$0 sm:$0xff] }
   0xf   :  { %478 = vmatpush3.bf16.msra.mxu0 %v563_v11  ;;  %v462_v61 = vld [vmem:[#allocation2] ss:$0 sm:$0xff] }
  0x10   :  { %518 = vmatpush3.bf16.msra.mxu1 %v564_v12  ;;  %479 = vmatprep.subr.bf16.mxu0 %v565_v13 }
  0x11   :  { %519 = vmatprep.subr.bf16.mxu1 %v589_v1 }
  0x13   :  { %480 = vmatpush3.bf16.msra.mxu0 %v566_v14 }
  0x14   :  { %520 = vmatpush3.bf16.msra.mxu1 %v567_v15  ;;  %481 = vmatprep.subr.bf16.mxu0 %v568_v16 }
  0x15   :  { %521 = vmatprep.subr.bf16.mxu1 %v589_v1 }
  0x17   :  { %482 = vmatpush3.bf16.msra.mxu0 %v569_v17 }
  0x18   :  { %522 = vmatpush3.bf16.msra.mxu1 %v570_v18  ;;  %483 = vmatprep.subr.bf16.mxu0 %v571_v19 }
  0x19   :  { %523 = vmatprep.subr.bf16.mxu1 %v589_v1 }
  0x1b   :  { %484 = vmatpush3.bf16.msra.mxu0 %v572_v20 }
  0x1c   :  { %524 = vmatpush3.bf16.msra.mxu1 %v573_v21  ;;  %485 = vmatprep.subr.bf16.mxu0 %v574_v22 }
  0x1d   :  { %525 = vmatprep.subr.bf16.mxu1 %v589_v1 }
  0x1f   :  { %486 = vmatpush3.bf16.msra.mxu0 %v575_v25 }
  0x20   :  { %526 = vmatpush3.bf16.msra.mxu1 %v576_v28  ;;  %531 = vmatprep.subr.bf16.mxu0 %v589_v1 }
  0x22   :  { %264 = vmatmul.mubr.bf16.vlgmr.msra.gmra.mxu0 %v29_v33 }
  0x23   :  { %528 = vmatmul.mubr.bf16.vlgmr.msra.gmra.mxu1 %v31_v34  ;;  %532 = vmatpush3.bf16.msra.mxu0 %v577_v32 }
  0x24   :  { %533 = vmatprep.subr.bf16.mxu0 %v589_v1  ;;  %547 = vmatprep.mubr.msk.bf16.mxu0 %vm590_vm0, %v589_v1 }
  0x27   :  { %534 = vmatpush3.bf16.msra.mxu0 %v578_v35 }
  0x28   :  { %535 = vmatprep.subr.bf16.mxu0 %v589_v1 }
  0x2b   :  { %536 = vmatpush3.bf16.msra.mxu0 %v579_v36 }
  0x2c   :  { %537 = vmatprep.subr.bf16.mxu0 %v589_v1 }
  0x2f   :  { %538 = vmatpush3.bf16.msra.mxu0 %v580_v37 }
  0x30   :  { %539 = vmatprep.subr.bf16.mxu0 %v589_v1 }
  0x33   :  { %540 = vmatpush3.bf16.msra.mxu0 %v581_v38 }
  0x34   :  { %541 = vmatprep.subr.bf16.mxu0 %v589_v1 }
  0x37   :  { %542 = vmatpush3.bf16.msra.mxu0 %v582_v39 }
  0x38   :  { %543 = vmatprep.subr.bf16.mxu0 %v589_v1 }
  0x3b   :  { %544 = vmatpush3.bf16.msra.mxu0 %v583_v40 }
  0x3c   :  { %545 = vmatprep.subr.bf16.mxu0 %v589_v1 }
  0x3f   :  { %546 = vmatpush3.bf16.msra.mxu0 %v584_v41 }
  0xe2   :  { %v487_v43 = vpop.f32.mrf.mxu0 }
  0xe3   :  { %v306_v44 = vpop.f32.mrf.mxu1 }
  0xe4   :  { %v488_v46 = vpop.f32.mrf.mxu0 }
  0xe5   :  { %v489_v47 = vadd.f32 %v488_v46, %v487_v43  ;;  %v529_v48 = vpop.f32.mrf.mxu1 }
  0xe6   :  { %v490_v49 = vpop.f32.mrf.mxu0 }
  0xe7   :  { %v266_v50 = vadd.f32 %v489_v47, %v437_v45  ;;  %v309_v51 = vpop.f32.mrf.mxu1 }
  0xe8   :  { %v491_v52 = vpop.f32.mrf.mxu0 }
  0xe9   :  { %v492_v53 = vadd.f32 %v491_v52, %v490_v49  ;;  %v530_v54 = vpop.f32.mrf.mxu1  ;;  %v307_v55 = vadd.f32 %v306_v44, %v266_v50 }
  0xeb   :  { %v269_v56 = vadd.f32 %v492_v53, %v437_v45  ;;  %v313_v58 = vmax.f32 %v307_v55, 0.0 }
  0xed   :  { %v310_v57 = vadd.f32 %v309_v51, %v269_v56 }
  0xef   :  { %v314_v59 = vmax.f32 %v310_v57, 0.0 }
  0xf1   :  { %v315_v60 = vpack.c.bf16 %v314_v59, %v313_v58 }
  0xf3   :  { %548 = vmatmul.mubr.bf16.vlgmr.msra.gmra.mxu0 %v315_v60 }
 0x1b3   :  { %v421_v62 = vpop.f32.mrf.mxu0 }
 0x1b4   :  { %v422_v63 = vadd.f32 %v462_v61, %v421_v62 }
 0x1b5   :  { %v549_v0 = vpop.f32.mrf.mxu0 }
 0x1b6   :  { %585 = vtanh.f32 %v422_v63 }
 0x1b7   :  { %v424_v1 = vpop.f32.mrf.mxu0 }
 0x1b8   :  { %v425_v2 = vadd.f32 %v462_v61, %v424_v1 }
 0x1b9   :  { %v550_v3 = vpop.f32.mrf.mxu0 }
 0x1ba   :  { %587 = vtanh.f32 %v425_v2 }
 0x1c3   :  { %v586_v4 = vpop.eup %585 }
 0x1c4   :  { %431 = vst.msk [vmem:[%s772_s5] sm:$0xff] %vm430_vm1, %v586_v4 }
 0x1c7   :  { %v588_v5 = vpop.eup %587 }
 0x1c8   :  { %432 = vst.msk [vmem:[%s772_s5 + $0x8] sm:$0xff] %vm430_vm1, %v588_v5 }

</bundles_post_ra>
